<compile_context>
chip_gen: v6e
topology: v6e:2x2x1
jax: 0.10.0
libtpu: 0.0.40
codegen_flags: <defaults>
</compile_context>

<pallas_src>
import functools

import jax
import jax.numpy as jnp
from jax.experimental import pallas as pl
from jax.experimental.pallas import tpu as pltpu

LN_EPS = 1e-5  # nn.LayerNorm default
_MIB = 1024 * 1024


def _round_up(n, m):
    return ((n + m - 1) // m) * m


# --------------------------------------------------------------------------- #
# Kernel
# --------------------------------------------------------------------------- #
def _projection_kernel(x_ref, w1_ref, w2_ref, consts_ref, o_ref,
                       h_acc, act_ref, *,
                       nk_in, nk_out, k_out, valid_cols, gelu_approximate):
    """One (row-tile i, contraction-slab k) grid step.

    k axis ("arbitrary", innermost) walks nk_in + nk_out slabs:
      k in [0, nk_in)            : h_acc += x[:, slab] @ W1[slab, :]   (emb1)
      k == nk_in - 1             : h_acc += b1 ; act = gelu(h_acc)     (stash bf16)
      k in [nk_in, nk_in+nk_out) : h_acc += act[:, slab] @ W2[slab, :] (+emb2)
      k == last                  : h_acc += b2 ; masked LayerNorm ; store
    Only one slab of each weight is VMEM-resident at a time.
    """
    k = pl.program_id(1)
    nk_total = nk_in + nk_out

    @pl.when(k == 0)
    def _init():
        h_acc[...] = jnp.zeros_like(h_acc)

    # ---- phase 1: emb1 = x @ W1, accumulated over in_f slabs (f32 MXU acc) --
    @pl.when(k < nk_in)
    def _acc_emb1():
        h_acc[...] += jnp.dot(x_ref[...], w1_ref[...],
                              preferred_element_type=jnp.float32)

    # ---- end of phase 1: + b1, GELU; keep emb1 resident in h_acc ------------
    @pl.when(k == nk_in - 1)
    def _bias_gelu():
        b1 = consts_ref[0:1, :]
        emb1 = h_acc[...] + b1
        h_acc[...] = emb1
        # Stash the activation (matmul dtype), pre-split along the W2
        # contraction so phase 2 indexes the cheap leading axis dynamically.
        for jj in range(nk_out):
            act_ref[jj] = jax.nn.gelu(
                emb1[:, jj * k_out:(jj + 1) * k_out],
                approximate=gelu_approximate).astype(act_ref.dtype)

    # ---- phase 2: h = emb1 + gelu(emb1) @ W2, accumulated over out_f slabs --
    @pl.when(k >= nk_in)
    def _acc_emb2():
        j = jnp.maximum(k - nk_in, 0)
        h_acc[...] += jnp.dot(act_ref[j], w2_ref[...],
                              preferred_element_type=jnp.float32)

    # ---- finalize: + b2 (dropout = identity in eval), LayerNorm, store ------
    @pl.when(k == nk_total - 1)
    def _finalize():
        c = consts_ref[...]                      # rows: b1, b2, gamma, beta
        h = h_acc[...] + c[1:2, :]               # + b2
        n_cols = h.shape[-1]
        if valid_cols == n_cols:
            mean = jnp.mean(h, axis=-1, keepdims=True)
            centered = h - mean
            var = jnp.mean(centered * centered, axis=-1, keepdims=True)
        else:
            # LayerNorm statistics over the real feature columns only
            # (features are zero-padded to a multiple of 128).
            col = jax.lax.broadcasted_iota(jnp.int32, h.shape, h.ndim - 1)
            mask = col < valid_cols
            inv_n = jnp.float32(1.0 / valid_cols)
            mean = jnp.sum(jnp.where(mask, h, 0.0), axis=-1,
                           keepdims=True) * inv_n
            centered = jnp.where(mask, h - mean, 0.0)
            var = jnp.sum(centered * centered, axis=-1, keepdims=True) * inv_n
        normed = centered * jax.lax.rsqrt(var + LN_EPS)
        y = normed * c[2:3, :] + c[3:4, :]
        o_ref[...] = y.astype(o_ref.dtype)


# --------------------------------------------------------------------------- #
# Static-config helpers (plain Python, run outside jit)
# --------------------------------------------------------------------------- #
def _derive_vmem_limit_bytes():
    """Physical VMEM minus headroom; never request the full capacity."""
    cap = None
    try:
        cap = getattr(pltpu.get_tpu_info(), "vmem_capacity_bytes", None)
    except Exception:
        cap = None
    if not cap:
        cap = 64 * _MIB          # conservative fallback (v7x per-TC VMEM)
    return int(max(32 * _MIB, cap - 16 * _MIB))


def _slab_config(n, target):
    """Pad feature dim n to a multiple of 128 and pick a contraction slab."""
    n128 = _round_up(max(n, 1), 128)
    slab = _round_up(min(target, n128), 128)
    n_pad = _round_up(n, slab)
    return n_pad, slab, n_pad // slab


def _choose_block_rows(M, preferred):
    """>=2 row tiles when possible (v7x megacore) and minimal row padding."""
    cap = max(8, _round_up(-(-M // 2), 8))        # <= ceil(M/2), multiple of 8
    best = max(8, (min(preferred, cap) // 8) * 8)
    best_pad = _round_up(M, best) - M
    t = best
    while t > 8 and best_pad > 0:
        t = max(8, ((t // 2) // 8) * 8)
        pad = _round_up(M, t) - M
        if pad < best_pad:
            best, best_pad = t, pad
    return best


# --------------------------------------------------------------------------- #
# Forward wrapper
# --------------------------------------------------------------------------- #
@functools.partial(
    jax.jit,
    static_argnames=("block_rows", "k_in", "k_out", "nk_in", "nk_out",
                     "in_f_pad", "out_f_pad", "matmul_dtype",
                     "gelu_approximate", "vmem_limit_bytes"))
def _projection_forward_impl(x, w1, b1, w2, b2, gamma, beta, *,
                             block_rows, k_in, k_out, nk_in, nk_out,
                             in_f_pad, out_f_pad, matmul_dtype,
                             gelu_approximate, vmem_limit_bytes):
    B, S, in_f = x.shape
    out_f = w1.shape[1]
    M = B * S
    m_pad = _round_up(M, block_rows)
    f32 = jnp.float32

    # x: reshape + cast + pad (only materialized when actually needed).
    # Padded columns/rows are zero so they are mathematically inert.
    # TODO(synk): enable CompilerParams(allow_input_fusion=...) once verified on
    # the target JAX build so XLA fuses this pad/cast into the pallas_call
    # producer and avoids an extra HBM pass over x.
    x2 = x.reshape(M, in_f)
    if x2.dtype != matmul_dtype:
        x2 = x2.astype(matmul_dtype)
    if (m_pad, in_f_pad) != (M, in_f):
        x2 = jnp.pad(x2, ((0, m_pad - M), (0, in_f_pad - in_f)))

    w1p = w1.astype(matmul_dtype)
    if w1p.shape != (in_f_pad, out_f_pad):
        w1p = jnp.pad(w1p, ((0, in_f_pad - in_f), (0, out_f_pad - out_f)))
    w2p = w2.astype(matmul_dtype)
    if w2p.shape != (out_f_pad, out_f_pad):
        w2p = jnp.pad(w2p, ((0, out_f_pad - out_f), (0, out_f_pad - out_f)))

    # b1/b2/gamma/beta fused into one (4, out_f_pad) f32 operand.
    consts = jnp.stack([b1, b2, gamma, beta]).astype(f32)
    if out_f_pad != out_f:
        consts = jnp.pad(consts, ((0, 0), (0, out_f_pad - out_f)))

    grid = (m_pad // block_rows, nk_in + nk_out)
    kernel = functools.partial(
        _projection_kernel, nk_in=nk_in, nk_out=nk_out, k_out=k_out,
        valid_cols=out_f, gelu_approximate=gelu_approximate)

    out = pl.pallas_call(
        kernel,
        out_shape=jax.ShapeDtypeStruct((m_pad, out_f_pad), x.dtype),
        grid_spec=pltpu.PrefetchScalarGridSpec(
            num_scalar_prefetch=0,
            grid=grid,
            in_specs=[
                # x row-tile, sliced along in_f during phase 1 (clamped after,
                # so no re-fetch happens during phase 2).
                pl.BlockSpec((block_rows, k_in),
                             lambda i, k: (i, jnp.minimum(k, nk_in - 1))),
                # W1 contraction slab (one slab VMEM-resident at a time).
                pl.BlockSpec((k_in, out_f_pad),
                             lambda i, k: (jnp.minimum(k, nk_in - 1), 0)),
                # W2 contraction slab.
                pl.BlockSpec((k_out, out_f_pad),
                             lambda i, k: (jnp.maximum(k - nk_in, 0), 0)),
                # fused b1/b2/gamma/beta (grid-invariant -> fetched once).
                pl.BlockSpec((4, out_f_pad), lambda i, k: (0, 0)),
            ],
            out_specs=pl.BlockSpec((block_rows, out_f_pad),
                                   lambda i, k: (i, 0)),
            scratch_shapes=[
                pltpu.VMEM((block_rows, out_f_pad), f32),               # h_acc
                pltpu.VMEM((nk_out, block_rows, k_out), matmul_dtype),  # act
            ]),
        compiler_params=pltpu.CompilerParams(
            dimension_semantics=("parallel", "arbitrary"),
            vmem_limit_bytes=vmem_limit_bytes),
    )(x2, w1p, w2p, consts)

    return out[:M, :out_f].reshape(B, S, out_f)


def projection_forward(x, w1, b1, w2, b2, gamma, beta, *,
                       block_rows=None, k_slab=512,
                       matmul_dtype=jnp.bfloat16, gelu_approximate=True):
    """x: [B, S, in_features] -> [B, S, out_features] (eval-mode forward)."""
    B, S, in_f = x.shape
    out_f = w1.shape[1]
    M = B * S

    vmem_limit = _derive_vmem_limit_bytes()
    in_f_pad, k_in, nk_in = _slab_config(in_f, k_slab)
    out_f_pad, k_out, nk_out = _slab_config(out_f, k_slab)

    if block_rows is None:
        # Bigger row tiles on 128-MiB-VMEM parts (v5e/v6e); 256 elsewhere.
        block_rows = 512 if vmem_limit >= 96 * _MIB else 256
    block_rows = _choose_block_rows(M, block_rows)

    # Keep the per-row-tile VMEM footprint comfortably inside the limit.
    itm = jnp.dtype(matmul_dtype).itemsize
    out_b = jnp.dtype(x.dtype).itemsize

    def footprint(br):
        return (br * out_f_pad * 4                      # h_acc (f32 scratch)
                + br * out_f_pad * itm                  # act scratch
                + 2 * br * out_f_pad * out_b            # out tile (dbl buffered)
                + 2 * br * k_in * itm                   # x tile   (dbl buffered)
                + 2 * (k_in + k_out) * out_f_pad * itm  # W1/W2 slabs (dbl buf)
                + 8 * out_f_pad * 4)                    # fused consts

    while block_rows > 64 and footprint(block_rows) > vmem_limit // 2:
        block_rows = max(64, ((block_rows // 2) // 8) * 8)

    return _projection_forward_impl(
        x, w1, b1, w2, b2, gamma, beta,
        block_rows=block_rows, k_in=k_in, k_out=k_out,
        nk_in=nk_in, nk_out=nk_out,
        in_f_pad=in_f_pad, out_f_pad=out_f_pad,
        matmul_dtype=matmul_dtype, gelu_approximate=gelu_approximate,
        vmem_limit_bytes=vmem_limit)


# --------------------------------------------------------------------------- #
# References / test
# --------------------------------------------------------------------------- #
def _init_params(key, in_features, out_features, dtype=jnp.float32):
    """Deterministic nn.Linear-style init (uniform +-1/sqrt(fan_in))."""
    k1, k2, k3, k4 = jax.random.split(key, 4)
    lim1 = 1.0 / jnp.sqrt(in_features)
    lim2 = 1.0 / jnp.sqrt(out_features)
    # stored pre-transposed: [in, out]
    w1 = jax.random.uniform(k1, (in_features, out_features), dtype, -lim1, lim1)
    b1 = jax.random.uniform(k2, (out_features,), dtype, -lim1, lim1)
    w2 = jax.random.uniform(k3, (out_features, out_features), dtype, -lim2, lim2)
    b2 = jax.random.uniform(k4, (out_features,), dtype, -lim2, lim2)
    gamma = jnp.ones((out_features,), dtype)
    beta = jnp.zeros((out_features,), dtype)
    return w1, b1, w2, b2, gamma, beta


def _layer_norm(h, gamma, beta):
    mean = jnp.mean(h, axis=-1, keepdims=True)
    var = jnp.mean((h - mean) ** 2, axis=-1, keepdims=True)
    return (h - mean) * jax.lax.rsqrt(var + LN_EPS) * gamma + beta


def _reference_bf16_path(x, w1, b1, w2, b2, gamma, beta, *,
                         matmul_dtype=jnp.bfloat16, gelu_approximate=True):
    """Mirrors the kernel's numerics: bf16 matmul operands, f32 accumulation."""
    emb1 = jnp.dot(x.astype(matmul_dtype), w1.astype(matmul_dtype),
                   preferred_element_type=jnp.float32) + b1
    act = jax.nn.gelu(emb1, approximate=gelu_approximate)
    emb2 = jnp.dot(act.astype(matmul_dtype), w2.astype(matmul_dtype),
                   preferred_element_type=jnp.float32) + b2
    return _layer_norm(emb1 + emb2, gamma, beta)


def _reference_f32(x, w1, b1, w2, b2, gamma, beta):
    """Pure-f32 semantics of the original PyTorch module (eval, exact GELU)."""
    emb1 = x @ w1 + b1
    emb2 = jax.nn.gelu(emb1, approximate=False) @ w2 + b2
    return _layer_norm(emb1 + emb2, gamma, beta)


if __name__ == "__main__":
    key = jax.random.PRNGKey(0)
    k_x, k_p = jax.random.split(key)

    batch, seq = 2, 8
    in_features, out_features = 32, 32

    x = jax.random.normal(k_x, (batch, seq, in_features), jnp.float32)
    params = _init_params(k_p, in_features, out_features)

    # TODO(synk): training-mode dropout (p=0.5) would need pltpu.prng_seed /
    # prng_random_bits masking + 1/(1-p) scaling; eval mode (identity) here.
    y = jax.block_until_ready(projection_forward(x, *params))

    assert y.shape == (batch, seq, out_features)
    assert bool(jnp.isfinite(y).all())

    # Tight check against a reference that mirrors the kernel's numerics
    # (bf16 matmul operands, f32 accumulation, tanh GELU).
    y_ref = _reference_bf16_path(x, *params)
    assert jnp.allclose(y, y_ref, atol=5e-4, rtol=5e-4), \
        "mismatch vs bf16-path reference"

    # Looser sanity check against pure-f32 / exact-GELU module semantics
    # (bf16 operands + tanh GELU introduce ~1e-2-scale noise post-LayerNorm).
    y_f32 = _reference_f32(x, *params)
    assert jnp.allclose(y, y_f32, atol=1e-1, rtol=1e-1), \
        "mismatch vs f32 reference"

    print("KERNEL_OK")
</pallas_src>

<mosaic_0001>
module attributes {stable_mosaic.version = 11 : i64} {
  func.func @_projection_kernel(%arg0: i32, %arg1: i32, %arg2: memref<8x128xbf16, #tpu.memory_space<vmem>>, %arg3: memref<128x128xbf16, #tpu.memory_space<vmem>>, %arg4: memref<128x128xbf16, #tpu.memory_space<vmem>>, %arg5: memref<4x128xf32, #tpu.memory_space<vmem>>, %arg6: memref<8x128xf32, #tpu.memory_space<vmem>>, %arg7: memref<8x128xf32, #tpu.memory_space<vmem>>, %arg8: memref<1x8x128xbf16, #tpu.memory_space<vmem>>) attributes {dimension_semantics = [#tpu.dimension_semantics<parallel>, #tpu.dimension_semantics<arbitrary>], iteration_bounds = array<i64: 2, 2>, scalar_prefetch = 0 : i64, scratch_operands = 2 : i64, tpu.core_type = #tpu.core_type<tc>, window_params = [{transform_indices = @transform_0, window_bounds = array<i64: 8, 128>}, {transform_indices = @transform_1, window_bounds = array<i64: 128, 128>}, {transform_indices = @transform_2, window_bounds = array<i64: 128, 128>}, {pipeline_mode = #tpu.pipeline_mode<synchronous>, transform_indices = @transform_3, window_bounds = array<i64: 4, 128>}, {transform_indices = @transform_4, window_bounds = array<i64: 8, 128>}]} {
    %c0_i32 = arith.constant 0 : i32
    %0 = arith.cmpi eq, %arg1, %c0_i32 : i32
    %1 = arith.extui %0 : i1 to i32
    %c0_i32_0 = arith.constant 0 : i32
    %2 = arith.cmpi ne, %1, %c0_i32_0 : i32
    scf.if %2 {
      %cst = arith.constant 0.000000e+00 : f32
      %15 = vector.broadcast %cst : f32 to vector<8x128xf32>
      %c0 = arith.constant 0 : index
      %c0_8 = arith.constant 0 : index
      %16 = vector.load %arg7[%c0, %c0_8] : memref<8x128xf32, #tpu.memory_space<vmem>>, vector<8x128xf32>
      tpu.vector_store %arg7[%c0, %c0_8], %15 {strides = array<i32>} : memref<8x128xf32, #tpu.memory_space<vmem>>, vector<8x128xf32>,
    } else {
    }
    %c1_i32 = arith.constant 1 : i32
    %3 = arith.cmpi slt, %arg1, %c1_i32 : i32
    %4 = arith.extui %3 : i1 to i32
    %c0_i32_1 = arith.constant 0 : i32
    %5 = arith.cmpi ne, %4, %c0_i32_1 : i32
    scf.if %5 {
      %c0 = arith.constant 0 : index
      %c0_8 = arith.constant 0 : index
      %15 = vector.load %arg7[%c0, %c0_8] : memref<8x128xf32, #tpu.memory_space<vmem>>, vector<8x128xf32>
      %c0_9 = arith.constant 0 : index
      %c0_10 = arith.constant 0 : index
      %16 = vector.load %arg2[%c0_9, %c0_10] : memref<8x128xbf16, #tpu.memory_space<vmem>>, vector<8x128xbf16>
      %c0_11 = arith.constant 0 : index
      %c0_12 = arith.constant 0 : index
      %17 = vector.load %arg3[%c0_11, %c0_12] : memref<128x128xbf16, #tpu.memory_space<vmem>>, vector<128x128xbf16>
      %cst = arith.constant dense<0.000000e+00> : vector<8x128xf32>
      %18 = tpu.matmul %16, %17, %cst {dimension_numbers = #tpu.dot_dimension_numbers<[1], [0], [0], [1], [0, 0, 1, 1], [], []>} : vector<8x128xbf16>, vector<128x128xbf16>, vector<8x128xf32> -> vector<8x128xf32>
      %19 = arith.addf %15, %18 : vector<8x128xf32>
      %c0_13 = arith.constant 0 : index
      %c0_14 = arith.constant 0 : index
      %20 = vector.load %arg7[%c0_13, %c0_14] : memref<8x128xf32, #tpu.memory_space<vmem>>, vector<8x128xf32>
      tpu.vector_store %arg7[%c0_13, %c0_14], %19 {strides = array<i32>} : memref<8x128xf32, #tpu.memory_space<vmem>>, vector<8x128xf32>,
    } else {
    }
    %c0_i32_2 = arith.constant 0 : i32
    %6 = arith.cmpi eq, %arg1, %c0_i32_2 : i32
    %7 = arith.extui %6 : i1 to i32
    %c0_i32_3 = arith.constant 0 : i32
    %8 = arith.cmpi ne, %7, %c0_i32_3 : i32
    scf.if %8 {
      %c0 = arith.constant 0 : index
      %c0_8 = arith.constant 0 : index
      %15 = vector.load %arg5[%c0, %c0_8] : memref<4x128xf32, #tpu.memory_space<vmem>>, vector<1x128xf32>
      %c0_9 = arith.constant 0 : index
      %c0_10 = arith.constant 0 : index
      %16 = vector.load %arg7[%c0_9, %c0_10] : memref<8x128xf32, #tpu.memory_space<vmem>>, vector<8x128xf32>
      %17 = vector.broadcast %15 : vector<1x128xf32> to vector<8x128xf32>
      %18 = arith.addf %16, %17 : vector<8x128xf32>
      %c0_11 = arith.constant 0 : index
      %c0_12 = arith.constant 0 : index
      %19 = vector.load %arg7[%c0_11, %c0_12] : memref<8x128xf32, #tpu.memory_space<vmem>>, vector<8x128xf32>
      tpu.vector_store %arg7[%c0_11, %c0_12], %18 {strides = array<i32>} : memref<8x128xf32, #tpu.memory_space<vmem>>, vector<8x128xf32>,
      %20 = arith.mulf %18, %18 : vector<8x128xf32>
      %21 = arith.mulf %18, %20 : vector<8x128xf32>
      %cst = arith.constant 4.471500e-02 : f32
      %22 = vector.broadcast %cst : f32 to vector<8x128xf32>
      %23 = arith.mulf %22, %21 : vector<8x128xf32>
      %24 = arith.addf %18, %23 : vector<8x128xf32>
      %cst_13 = arith.constant 0.797884583 : f32
      %25 = vector.broadcast %cst_13 : f32 to vector<8x128xf32>
      %26 = arith.mulf %25, %24 : vector<8x128xf32>
      %27 = math.tanh %26 : vector<8x128xf32>
      %cst_14 = arith.constant 1.000000e+00 : f32
      %28 = vector.broadcast %cst_14 : f32 to vector<8x128xf32>
      %29 = arith.addf %28, %27 : vector<8x128xf32>
      %cst_15 = arith.constant 5.000000e-01 : f32
      %30 = vector.broadcast %cst_15 : f32 to vector<8x128xf32>
      %31 = arith.mulf %30, %29 : vector<8x128xf32>
      %32 = arith.mulf %18, %31 : vector<8x128xf32>
      %33 = arith.truncf %32 : vector<8x128xf32> to vector<8x128xbf16>
      %c0_16 = arith.constant 0 : index
      %c0_17 = arith.constant 0 : index
      %c0_18 = arith.constant 0 : index
      %34 = vector.load %arg8[%c0_16, %c0_17, %c0_18] : memref<1x8x128xbf16, #tpu.memory_space<vmem>>, vector<1x8x128xbf16>
      %35 = vector.shape_cast %34 : vector<1x8x128xbf16> to vector<8x128xbf16>
      %36 = vector.shape_cast %33 : vector<8x128xbf16> to vector<1x8x128xbf16>
      tpu.vector_store %arg8[%c0_16, %c0_17, %c0_18], %36 {strides = array<i32>} : memref<1x8x128xbf16, #tpu.memory_space<vmem>>, vector<1x8x128xbf16>,
    } else {
    }
    %c1_i32_4 = arith.constant 1 : i32
    %9 = arith.cmpi sge, %arg1, %c1_i32_4 : i32
    %10 = arith.extui %9 : i1 to i32
    %c0_i32_5 = arith.constant 0 : i32
    %11 = arith.cmpi ne, %10, %c0_i32_5 : i32
    scf.if %11 {
      %c1_i32_8 = arith.constant 1 : i32
      %15 = arith.subi %arg1, %c1_i32_8 : i32
      %c0_i32_9 = arith.constant 0 : i32
      %16 = arith.maxsi %15, %c0_i32_9 : i32
      %c0 = arith.constant 0 : index
      %c0_10 = arith.constant 0 : index
      %17 = vector.load %arg7[%c0, %c0_10] : memref<8x128xf32, #tpu.memory_space<vmem>>, vector<8x128xf32>
      %18 = arith.index_cast %16 : i32 to index
      %c0_11 = arith.constant 0 : index
      %c0_12 = arith.constant 0 : index
      %19 = vector.load %arg8[%18, %c0_11, %c0_12] : memref<1x8x128xbf16, #tpu.memory_space<vmem>>, vector<1x8x128xbf16>
      %20 = vector.shape_cast %19 : vector<1x8x128xbf16> to vector<8x128xbf16>
      %c0_13 = arith.constant 0 : index
      %c0_14 = arith.constant 0 : index
      %21 = vector.load %arg4[%c0_13, %c0_14] : memref<128x128xbf16, #tpu.memory_space<vmem>>, vector<128x128xbf16>
      %cst = arith.constant dense<0.000000e+00> : vector<8x128xf32>
      %22 = tpu.matmul %20, %21, %cst {dimension_numbers = #tpu.dot_dimension_numbers<[1], [0], [0], [1], [0, 0, 1, 1], [], []>} : vector<8x128xbf16>, vector<128x128xbf16>, vector<8x128xf32> -> vector<8x128xf32>
      %23 = arith.addf %17, %22 : vector<8x128xf32>
      %c0_15 = arith.constant 0 : index
      %c0_16 = arith.constant 0 : index
      %24 = vector.load %arg7[%c0_15, %c0_16] : memref<8x128xf32, #tpu.memory_space<vmem>>, vector<8x128xf32>
      tpu.vector_store %arg7[%c0_15, %c0_16], %23 {strides = array<i32>} : memref<8x128xf32, #tpu.memory_space<vmem>>, vector<8x128xf32>,
    } else {
    }
    %c1_i32_6 = arith.constant 1 : i32
    %12 = arith.cmpi eq, %arg1, %c1_i32_6 : i32
    %13 = arith.extui %12 : i1 to i32
    %c0_i32_7 = arith.constant 0 : i32
    %14 = arith.cmpi ne, %13, %c0_i32_7 : i32
    scf.if %14 {
      %c0 = arith.constant 0 : index
      %c0_8 = arith.constant 0 : index
      %15 = vector.load %arg5[%c0, %c0_8] : memref<4x128xf32, #tpu.memory_space<vmem>>, vector<4x128xf32>
      %c0_9 = arith.constant 0 : index
      %c0_10 = arith.constant 0 : index
      %16 = vector.load %arg7[%c0_9, %c0_10] : memref<8x128xf32, #tpu.memory_space<vmem>>, vector<8x128xf32>
      %17 = vector.extract_strided_slice %15 {offsets = [1, 0], sizes = [1, 128], strides = [1, 1]} : vector<4x128xf32> to vector<1x128xf32>
      %18 = vector.broadcast %17 : vector<1x128xf32> to vector<8x128xf32>
      %19 = arith.addf %16, %18 : vector<8x128xf32>
      %20 = tpu.iota {dimensions = array<i32: 1>} : vector<8x128xi32>
      %c32_i32 = arith.constant 32 : i32
      %21 = vector.broadcast %c32_i32 : i32 to vector<8x128xi32>
      %22 = arith.cmpi slt, %20, %21 : vector<8x128xi32>
      %cst = arith.constant 0.000000e+00 : f32
      %23 = vector.broadcast %cst : f32 to vector<8x128xf32>
      %24 = arith.select %22, %19, %23 : vector<8x128xi1>, vector<8x128xf32>
      %cst_11 = arith.constant dense<0.000000e+00> : vector<8xf32>
      %25 = vector.multi_reduction <add>, %24, %cst_11 [1] : vector<8x128xf32> to vector<8xf32>
      %26 = vector.shape_cast %25 : vector<8xf32> to vector<8x1xf32>
      %cst_12 = arith.constant 3.125000e-02 : f32
      %27 = vector.broadcast %cst_12 : f32 to vector<8x1xf32>
      %28 = arith.mulf %26, %27 : vector<8x1xf32>
      %29 = vector.broadcast %28 : vector<8x1xf32> to vector<8x128xf32>
      %30 = arith.subf %19, %29 : vector<8x128xf32>
      %cst_13 = arith.constant 0.000000e+00 : f32
      %31 = vector.broadcast %cst_13 : f32 to vector<8x128xf32>
      %32 = arith.select %22, %30, %31 : vector<8x128xi1>, vector<8x128xf32>
      %33 = arith.mulf %32, %32 : vector<8x128xf32>
      %cst_14 = arith.constant dense<0.000000e+00> : vector<8xf32>
      %34 = vector.multi_reduction <add>, %33, %cst_14 [1] : vector<8x128xf32> to vector<8xf32>
      %35 = vector.shape_cast %34 : vector<8xf32> to vector<8x1xf32>
      %cst_15 = arith.constant 3.125000e-02 : f32
      %36 = vector.broadcast %cst_15 : f32 to vector<8x1xf32>
      %37 = arith.mulf %35, %36 : vector<8x1xf32>
      %cst_16 = arith.constant 9.99999974E-6 : f32
      %38 = vector.broadcast %cst_16 : f32 to vector<8x1xf32>
      %39 = arith.addf %37, %38 : vector<8x1xf32>
      %40 = math.rsqrt %39 : vector<8x1xf32>
      %41 = vector.broadcast %40 : vector<8x1xf32> to vector<8x128xf32>
      %42 = arith.mulf %32, %41 : vector<8x128xf32>
      %43 = vector.extract_strided_slice %15 {offsets = [2, 0], sizes = [1, 128], strides = [1, 1]} : vector<4x128xf32> to vector<1x128xf32>
      %44 = vector.broadcast %43 : vector<1x128xf32> to vector<8x128xf32>
      %45 = arith.mulf %42, %44 : vector<8x128xf32>
      %46 = vector.extract_strided_slice %15 {offsets = [3, 0], sizes = [1, 128], strides = [1, 1]} : vector<4x128xf32> to vector<1x128xf32>
      %47 = vector.broadcast %46 : vector<1x128xf32> to vector<8x128xf32>
      %48 = arith.addf %45, %47 : vector<8x128xf32>
      %c0_17 = arith.constant 0 : index
      %c0_18 = arith.constant 0 : index
      %49 = vector.load %arg6[%c0_17, %c0_18] : memref<8x128xf32, #tpu.memory_space<vmem>>, vector<8x128xf32>
      tpu.vector_store %arg6[%c0_17, %c0_18], %48 {strides = array<i32>} : memref<8x128xf32, #tpu.memory_space<vmem>>, vector<8x128xf32>,
    } else {
    }
    return
  }
  func.func @transform_0(%arg0: i32, %arg1: i32) -> (i32, i32) {
    %c0_i32 = arith.constant 0 : i32
    %0 = arith.minsi %arg1, %c0_i32 : i32
    %c0_i32_0 = arith.constant 0 : i32
    return %arg0, %0 : i32, i32
  }
  func.func @transform_1(%arg0: i32, %arg1: i32) -> (i32, i32) {
    %c0_i32 = arith.constant 0 : i32
    %0 = arith.minsi %arg1, %c0_i32 : i32
    %c0_i32_0 = arith.constant 0 : i32
    %c0_i32_1 = arith.constant 0 : i32
    return %0, %c0_i32_0 : i32, i32
  }
  func.func @transform_2(%arg0: i32, %arg1: i32) -> (i32, i32) {
    %c1_i32 = arith.constant 1 : i32
    %0 = arith.subi %arg1, %c1_i32 : i32
    %c0_i32 = arith.constant 0 : i32
    %1 = arith.maxsi %0, %c0_i32 : i32
    %c0_i32_0 = arith.constant 0 : i32
    %c0_i32_1 = arith.constant 0 : i32
    return %1, %c0_i32_0 : i32, i32
  }
  func.func @transform_3(%arg0: i32, %arg1: i32) -> (i32, i32) {
    %c0_i32 = arith.constant 0 : i32
    %c0_i32_0 = arith.constant 0 : i32
    %c0_i32_1 = arith.constant 0 : i32
    return %c0_i32, %c0_i32_0 : i32, i32
  }
  func.func @transform_4(%arg0: i32, %arg1: i32) -> (i32, i32) {
    %c0_i32 = arith.constant 0 : i32
    %c0_i32_0 = arith.constant 0 : i32
    return %arg0, %c0_i32 : i32, i32
  }
}

</mosaic_0001>

<bundles_post_ra>
// kernel: _projection_forward_impl.1
= control target key start
LH: loop header
LB: loop body
LE: loop exit
PB: predicated region body
PF: predicated region fallthrough
CT: control target
= control target key end

     0   :  { %s933_s15 = smov 0   ;;  %s935_s16 = smov 0   ;;  %s1044_s0 = inlined_call_operand.vmem [shape: bf16[16,128], index: 0, kind: input, shape index: {}]   ;;  %s1045_s1 = inlined_call_operand.vmem [shape: bf16[128,128], index: 1, kind: input, shape index: {}]   ;;  %s1046_s2 = inlined_call_operand.vmem [shape: bf16[128,128], index: 2, kind: input, shape index: {}]   ;;  %s1047_s3 = inlined_call_operand.vmem [shape: f32[4,128], index: 3, kind: input, shape index: {}]   ;;  %s1048_s4 = inlined_call_operand.vmem [shape: f32[16,128], index: 4, kind: output, shape index: {}]  }
   0x1   :  { %s937_s17 = smov 0   ;;  %s939_s18 = smov 0  }
   0x2   :  { %s941_s19 = smov 0  }
   0x3 LB: > { %s23_s20 = sadd.s32 1, %s893_s17  ;;  %s26_s21 = sadd.s32 1, %s897_s18  ;;  %s901_s19 = sphi %s941_s19, %s14_s19   ;;  %s897_s18 = sphi %s939_s18, %s1052_s18   ;;  %s893_s17 = sphi %s937_s17, %s1051_s17   ;;  %s889_s16 = sphi %s935_s16, %s1050_s16   ;;  %s885_s15 = sphi %s933_s15, %s1049_s15  }
   0x4   : > { %p24_p0 = scmp.ge.s32.totalorder %s23_s20, 2  ;;  %p703_p1 = scmp.ge.s32.totalorder %s901_s19, 1 }
   0x5   : > { %p228_p2 = scmp.lt.s32.totalorder %s901_s19, 5 }
   0x6   : > { %s1054_s20 = smov (%p24_p0, %s23_s20), 0  ;;  %s1056_s21 = smov (!%p24_p0, %s26_s21), %s897_s18 }
   0x7   : > { %p229_p3 = pnand %p703_p1, %p228_p2  ;;  %p28_p4 = scmp.ge.s32.totalorder %s1056_s21, 2 }
   0x8   : > { %p272_p5 = scmp.lt.s32.totalorder (!%p229_p3), %s885_s15, 0  ;;  %p274_p6 = scmp.lt.s32.totalorder (!%p229_p3), %s889_s16, 1 }
   0x9   : > { %s1058_s21 = smov (%p28_p4, %s1056_s21), 0  ;;  %232 = sbr.rel (%p229_p3) target bundleno = 876 (0x36c), region = 36 }
   0xa   : > { %s710_s22 = sadd.s32 (!%p229_p3), 4294967295, %s885_s15  ;;  %p714_p10 = scmp.ne.s32.totalorder (!%p229_p3), %s885_s15, 0 }
   0xb   : > { %p294_p7 = scmp.gt.s32.totalorder (!%p229_p3), %s710_s22, 0 }
   0xe   : > { %s273_s23 = scalar_select %p272_p5, %s885_s15, 0 }
   0xf   : > { %s1060_s16 = smov (!%p274_p6, %s889_s16), 1  ;;  %s1064_s22 = smov (!%p294_p7, %s710_s22), 0 }
  0x10   : > { %s277_s24 = scalar_select %p272_p5, %s273_s23, 0 }
  0x11   : > { %s708_s25 = sshll.u32 %s273_s23, 4  ;;  %s713_s28 = sshll.u32 %s1060_s16, 3 }
  0x12   : > { %s278_s26 = sadd.s32 %s277_s24, %s1060_s16  ;;  %p286_p8 = scmp.lt.s32.totalorder %s708_s25, 15 }
  0x13   : > { %s968_s27 = sshll.u32 %s278_s26, 2  ;;  %s977_s8 = scalar_lea.vmem %s1048_s4, %s713_s28 }
  0x14   : > { %s280_s5 = scalar_lea.vmem %s1044_s0, %s968_s27  ;;  %s1062_s25 = smov (!%p286_p8, %s708_s25), 15 }
  0x15   : > { %s709_s9 = sshll.u32 %s1062_s25, 2  ;;  %s711_s13 = sshll.u32 %s1064_s22, 4 }
  0x16   : > { %s984_s12 = scalar_lea.vmem %s1045_s1, %s709_s9  ;;  %p297_p9 = scmp.lt.s32.totalorder %s711_s13, 15 }
  0x17   : > { %313 = sbr.rel (%p714_p10) target bundleno = 30 (0x1e), region = 40 }
  0x18   : > { %s1066_s13 = smov (!%p297_p9, %s711_s13), 15 }
  0x19   : > { %s712_s14 = sshll.u32 %s1066_s13, 2 }
  0x1a   : > { %s990_s24 = scalar_lea.vmem %s1046_s2, %s712_s14 }
  0x1c   : > { %v903_v0 = vmov 0.0  }
  0x1d   : > { %314 = vst [vmem:[#allocation2] sm:$0xff] %v903_v0 }
  0x1e PF: > { %p715_p11 = scmp.ge.s32.totalorder %s885_s15, 1 }
  0x20   : > { %318 = sbr.rel (%p715_p11) target bundleno = 269 (0x10d), region = 44 }
  0x25   : > { %v843_v1 = vld [vmem:[%s984_s12 + $0x38] sm:$0xff]   ;;  %v904_v2 = vmov 0.0   ;;  %v844_v3 = vld [vmem:[%s984_s12 + $0x30] sm:$0xff]   ;;  %vm905_vm0 = vmmov 0   ;;  %v845_v4 = vld [vmem:[%s984_s12 + $0x28] sm:$0xff]  }
  0x26   : > { %758 = vmatprep.subr.bf16.mxu0 %v904_v2  ;;  %774 = vmatprep.mubr.msk.bf16.mxu0 %vm905_vm0, %v904_v2  ;;  %v846_v5 = vld [vmem:[%s984_s12 + $0x20] sm:$0xff]   ;;  %v847_v6 = vld [vmem:[%s984_s12 + $0x18] sm:$0xff]   ;;  %v848_v7 = vld [vmem:[%s984_s12 + $0x10] sm:$0xff]  }
  0x27   : > { %759 = vmatpush3.bf16.msra.mxu0 %v843_v1  ;;  %v849_v8 = vld [vmem:[%s984_s12 + $0x8] sm:$0xff]   ;;  %v850_v9 = vld [vmem:[%s984_s12] sm:$0xff]  }
  0x28   : > { %760 = vmatprep.subr.bf16.mxu0 %v904_v2  ;;  %v320_v10 = vld [vmem:[%s280_s5] sm:$0xf] }
  0x29   : > { %v319_v11 = vld [vmem:[#allocation2] sm:$0xff] }
  0x2b   : > { %761 = vmatpush3.bf16.msra.mxu0 %v844_v3 }
  0x2c   : > { %762 = vmatprep.subr.bf16.mxu0 %v904_v2 }
  0x2f   : > { %763 = vmatpush3.bf16.msra.mxu0 %v845_v4 }
  0x30   : > { %764 = vmatprep.subr.bf16.mxu0 %v904_v2 }
  0x33   : > { %765 = vmatpush3.bf16.msra.mxu0 %v846_v5 }
  0x34   : > { %766 = vmatprep.subr.bf16.mxu0 %v904_v2 }
  0x37   : > { %767 = vmatpush3.bf16.msra.mxu0 %v847_v6 }
  0x38   : > { %768 = vmatprep.subr.bf16.mxu0 %v904_v2 }
  0x3b   : > { %769 = vmatpush3.bf16.msra.mxu0 %v848_v7 }
  0x3c   : > { %770 = vmatprep.subr.bf16.mxu0 %v904_v2 }
  0x3f   : > { %771 = vmatpush3.bf16.msra.mxu0 %v849_v8 }
  0x40   : > { %772 = vmatprep.subr.bf16.mxu0 %v904_v2 }
  0x43   : > { %773 = vmatpush3.bf16.msra.mxu0 %v850_v9 }
  0x46   : > { %775 = vmatmul.mubr.bf16.vlgmr.msra.gmra.mxu0 %v320_v10 }
 0x106   : > { %v419_v12 = vpop.f32.mrf.mxu0 }
 0x107   : > { %v425_v13 = vadd.f32 %v419_v12, %v319_v11 }
 0x108   : > { %v776_v14 = vpop.f32.mrf.mxu0 }
 0x109   : > { %426 = vst [vmem:[#allocation2] sm:$0xff] %v425_v13 }
 0x10a   : > { %v422_v15 = vpop.f32.mrf.mxu0 }
 0x10c   : > { %v777_v16 = vpop.f32.mrf.mxu0 }
 0x10d PF: > { %429 = sbr.rel (%p714_p10) target bundleno = 311 (0x137), region = 48 }
 0x112   : > { %v725_v17 = vld [vmem:[%s1047_s3] ss:$0 sm:$0xff] }
 0x113   : > { %v431_v18 = vld [vmem:[#allocation2] sm:$0xff] }
 0x114   : > { %v436_v19 = vadd.f32 %v725_v17, %v431_v18 }
 0x116   : > { %437 = vst [vmem:[#allocation2] sm:$0xff] %v436_v19  ;;  %v438_v20 = vmul.f32 %v436_v19, %v436_v19 }
 0x118   : > { %v439_v21 = vmul.f32 %v438_v20, %v436_v19 }
 0x11a   : > { %v440_v22 = vmul.f32 0.044715, %v439_v21 }
 0x11c   : > { %v441_v23 = vadd.f32 %v440_v22, %v436_v19 }
 0x11e   : > { %v442_v24 = vmul.f32 0.7978846, %v441_v23 }
 0x120   : > { %851 = vtanh.f32 %v442_v24 }
 0x12d   : > { %v852_v25 = vpop.eup %851 }
 0x12e   : > { %v444_v26 = vadd.f32 1.0, %v852_v25 }
 0x130   : > { %v445_v27 = vmul.f32 0.5, %v444_v26 }
 0x132   : > { %v446_v28 = vmul.f32 %v445_v27, %v436_v19 }
 0x134   : > { %v447_v29 = vpack.c.bf16 %v446_v28, %v446_v28 }
 0x136   : > { %448 = vst [vmem:[#allocation3] sm:$0xf] %v447_v29 }
 0x137 PF: > { %p726_p12 = scmp.lt.s32.totalorder %s885_s15, 1 }
 0x138   : > { %s728_s27 = sshll.u32 (!%p726_p12), %s1064_s22, 2 }
 0x139   : > { %452 = sbr.rel (%p726_p12) target bundleno = 550 (0x226), region = 52  ;;  %s458_s30 = scalar_lea.vmem (!%p726_p12), [#allocation3], %s728_s27 }
 0x13e   : > { %v853_v30 = vld [vmem:[%s990_s24 + $0x38] sm:$0xff]   ;;  %v906_v31 = vmov 0.0   ;;  %v854_v32 = vld [vmem:[%s990_s24 + $0x30] sm:$0xff]   ;;  %vm907_vm1 = vmmov 0   ;;  %v855_v33 = vld [vmem:[%s990_s24 + $0x28] sm:$0xff]  }
 0x13f   : > { %778 = vmatprep.subr.bf16.mxu0 %v906_v31  ;;  %794 = vmatprep.mubr.msk.bf16.mxu0 %vm907_vm1, %v906_v31  ;;  %v856_v34 = vld [vmem:[%s990_s24 + $0x20] sm:$0xff]   ;;  %v857_v35 = vld [vmem:[%s990_s24 + $0x18] sm:$0xff]   ;;  %v858_v36 = vld [vmem:[%s990_s24 + $0x10] sm:$0xff]  }
 0x140   : > { %779 = vmatpush3.bf16.msra.mxu0 %v853_v30  ;;  %v859_v37 = vld [vmem:[%s990_s24 + $0x8] sm:$0xff]   ;;  %v860_v38 = vld [vmem:[%s990_s24] sm:$0xff]  }
 0x141   : > { %780 = vmatprep.subr.bf16.mxu0 %v906_v31  ;;  %v459_v39 = vld [vmem:[%s458_s30] sm:$0xf] }
 0x142   : > { %v456_v40 = vld [vmem:[#allocation2] sm:$0xff] }
 0x144   : > { %781 = vmatpush3.bf16.msra.mxu0 %v854_v32 }
 0x145   : > { %782 = vmatprep.subr.bf16.mxu0 %v906_v31 }
 0x148   : > { %783 = vmatpush3.bf16.msra.mxu0 %v855_v33 }
 0x149   : > { %784 = vmatprep.subr.bf16.mxu0 %v906_v31 }
 0x14c   : > { %785 = vmatpush3.bf16.msra.mxu0 %v856_v34 }
 0x14d   : > { %786 = vmatprep.subr.bf16.mxu0 %v906_v31 }
 0x150   : > { %787 = vmatpush3.bf16.msra.mxu0 %v857_v35 }
 0x151   : > { %788 = vmatprep.subr.bf16.mxu0 %v906_v31 }
 0x154   : > { %789 = vmatpush3.bf16.msra.mxu0 %v858_v36 }
 0x155   : > { %790 = vmatprep.subr.bf16.mxu0 %v906_v31 }
 0x158   : > { %791 = vmatpush3.bf16.msra.mxu0 %v859_v37 }
 0x159   : > { %792 = vmatprep.subr.bf16.mxu0 %v906_v31 }
 0x15c   : > { %793 = vmatpush3.bf16.msra.mxu0 %v860_v38 }
 0x15f   : > { %795 = vmatmul.mubr.bf16.vlgmr.msra.gmra.mxu0 %v459_v39 }
 0x21f   : > { %v558_v41 = vpop.f32.mrf.mxu0 }
 0x220   : > { %v564_v42 = vadd.f32 %v558_v41, %v456_v40 }
 0x221   : > { %v796_v43 = vpop.f32.mrf.mxu0 }
 0x222   : > { %565 = vst [vmem:[#allocation2] sm:$0xff] %v564_v42 }
 0x223   : > { %v561_v44 = vpop.f32.mrf.mxu0 }
 0x225   : > { %v797_v45 = vpop.f32.mrf.mxu0 }
 0x226 PF: > { %p737_p13 = scmp.ne.s32.totalorder %s885_s15, 1 }
 0x228   : > { %569 = sbr.rel (%p737_p13) target bundleno = 876 (0x36c), region = 56 }
 0x22d   : > { %v572_v46 = vlaneseq  ;;  %v570_v48 = vld [vmem:[%s1047_s3] sm:$0xf] }
 0x22e   : > { %v571_v53 = vld [vmem:[#allocation2] sm:$0xff] }
 0x22f   : > { %v573_v47 = vshrl.u32 %v572_v46, 7  ;;  %v578_v49 = vand.u32 127, %v572_v46 }
 0x231   : > { %v574_v50 = vsub.s32 1, %v573_v47  ;;  %v595_v51 = vsub.s32 2, %v573_v47  ;;  %v600_v52 = vsub.s32 3, %v573_v47  ;;  %vm579_vm2 = vcmp.lt.s32.totalorder %v578_v49, 32 }
 0x233   : > { %v575_v54 = vrot.slane %v570_v48, %v574_v50  ;;  %v596_v55 = vrot.slane %v570_v48, %v595_v51  ;;  %v601_v56 = vrot.slane %v570_v48, %v600_v52 }
 0x235   : > { %v576_v57 = vadd.f32 %v575_v54, %v571_v53 }
 0x237   : > { %v580_v58 = vsel %vm579_vm2, %v576_v57, 0.0 }
 0x238   : > { %581 = vadd.xlane.f32.xlu0 %v580_v58 }
 0x2c1   : > { %v582_v59 = vpop.xlane.xlu0 %581 }
 0x2c2   : > { %v583_v60 = vmul.f32 0.03125, %v582_v59 }
 0x2c4   : > { %v584_v61 = vsub.f32 %v576_v57, %v583_v60 }
 0x2c6   : > { %v585_v62 = vsel %vm579_vm2, %v584_v61, 0.0 }
 0x2c7   : > { %v586_v63 = vmul.f32 %v585_v62, %v585_v62 }
 0x2c9   : > { %587 = vadd.xlane.f32.xlu0 %v586_v63 }
 0x352   : > { %v588_v0 = vpop.xlane.xlu0 %587 }
 0x353   : > { %v589_v1 = vmul.f32 0.03125, %v588_v0 }
 0x355   : > { %v590_v2 = vadd.f32 1e-05, %v589_v1 }
 0x357   : > { %861 = vrsqrt.f32 %v590_v2 }
 0x364   : > { %v862_v3 = vpop.eup %861 }
 0x365   : > { %v592_v4 = vmul.f32 %v862_v3, %v585_v62 }
 0x367   : > { %v597_v5 = vmul.f32 %v596_v55, %v592_v4 }
 0x369   : > { %v602_v6 = vadd.f32 %v601_v56, %v597_v5 }
 0x36b   : > { %603 = vst [vmem:[%s977_s8] sm:$0xff] %v602_v6 }
 0x36c PF: > { %s14_s19 = sadd.s32 1, %s901_s19   ;;  %s1049_s15 = smov %s893_s17 }
 0x36d   : > { %p11_p0 = scmp.ge.s32.totalorder %s14_s19, 6   ;;  %s1050_s16 = smov %s897_s18 }
 0x36e   : > { %s1051_s17 = smov %s1054_s20  ;;  %s1052_s18 = smov %s1058_s21 }
 0x36f   :  { %13 = sbr.rel (!%p11_p0) target bundleno = 3 (0x3), region = 93 }

</bundles_post_ra>
